<compile_context>
chip_gen: v7x
topology: tpu7x:2x2x1
jax: 0.10.0
libtpu: 0.0.40
codegen_flags: <defaults>
</compile_context>

<pallas_src>
import jax
import jax.numpy as jnp
from jax import lax
from jax.experimental import pallas as pl
from jax.experimental.pallas import tpu as pltpu


def _round_up(x, m):
    return ((x + m - 1) // m) * m


def _ntm_read_seq_kernel(hid_ref, winit_ref, wfc_ref, bfc_ref, memht_ref,
                         mem_ref, out_ref, wstate_ref):
    t = pl.program_id(0)
    n_dim = mem_ref.shape[0]
    m_dim = mem_ref.shape[1]

    @pl.when(t == 0)
    def _():
        wstate_ref[...] = winit_ref[...]

    hid = hid_ref[0]            # (Bp, C)
    w_pre = wstate_ref[...]     # (Bp, N)  running state, persists across steps

    # ---- fc_read as ONE fused dot: (Bp, C) @ (C, M+6), then lane slices.
    o = jnp.dot(hid, wfc_ref[...],
                preferred_element_type=jnp.float32) + bfc_ref[...]
    k = o[:, :m_dim]                                   # (Bp, M)
    beta = jax.nn.softplus(o[:, m_dim:m_dim + 1])      # (Bp, 1)
    g = jax.nn.sigmoid(o[:, m_dim + 1:m_dim + 2])      # (Bp, 1)
    s = jax.nn.softmax(o[:, m_dim + 2:m_dim + 5], axis=1)   # (Bp, 3)
    gamma = 1.0 + jax.nn.softplus(o[:, m_dim + 5:m_dim + 6])  # (Bp, 1)

    # ---- content addressing: softmax_N(beta * cos_sim(memory + eps, k + eps))
    k_e = k + 1e-16
    k_hat = k_e * lax.rsqrt(
        jnp.maximum(jnp.sum(k_e * k_e, axis=1, keepdims=True), 1e-16))
    cos = jnp.dot(k_hat, memht_ref[...],
                  preferred_element_type=jnp.float32)          # (Bp, N)
    z = beta * cos
    e = jnp.exp(z - jnp.max(z, axis=1, keepdims=True))
    # approx reciprocal OK here (renormalized exactly at the end of the step)
    wc = e * pl.reciprocal(jnp.sum(e, axis=1, keepdims=True), approx=True)

    # ---- interpolation with previous weighting
    wgt = g * wc + (1.0 - g) * w_pre

    # ---- 3-tap circular shift: wrap-padded buffer + static lane slices
    wg_pad = jnp.concatenate(
        [wgt[:, n_dim - 1:], wgt, wgt[:, :1]], axis=1)         # (Bp, N+2)
    w_hat = (s[:, 0:1] * wg_pad[:, 0:n_dim]            # wg[(i-1) mod N]
             + s[:, 1:2] * wg_pad[:, 1:n_dim + 1]      # wg[i]
             + s[:, 2:3] * wg_pad[:, 2:n_dim + 2])     # wg[(i+1) mod N]

    # ---- sharpening (EUP) + EXACT final normalization (w feeds back)
    w_pow = jnp.exp(gamma * jnp.log(w_hat + 1e-30))
    w_new = w_pow / (jnp.sum(w_pow, axis=1, keepdims=True) + 1e-16)
    wstate_ref[...] = w_new

    # ---- read: r = w @ memory
    r = jnp.dot(w_new, mem_ref[...], preferred_element_type=jnp.float32)

    # ---- single lane-dense store: [r | w | zero-pad] -> full 128-lane tile
    pad = out_ref.shape[2] - (m_dim + n_dim)
    pieces = [r, w_new]
    if pad > 0:
        pieces.append(jnp.zeros((r.shape[0], pad), jnp.float32))
    out_ref[0] = jnp.concatenate(pieces, axis=1)


@jax.jit
def ntm_read_head_sequence(hid_seq, w_init, weight, bias, memory):
    """Apply NTMReadHead.forward over T steps with w fed back, in ONE kernel.

    hid_seq: (T, B, C); w_init: (B, N); weight: (M+6, C); bias: (M+6,);
    memory: (N, M).  Returns (r_seq (T,B,M), w_seq (T,B,N)).
    """
    f32 = jnp.float32
    hid_seq = hid_seq.astype(f32)
    w_init = w_init.astype(f32)
    weight = jnp.asarray(weight, f32)
    bias = jnp.asarray(bias, f32)
    memory = jnp.asarray(memory, f32)

    T, B, C = hid_seq.shape
    N, M = memory.shape
    Bp = _round_up(B, 8)               # sublane-dense batch
    OUT = _round_up(M + N, 128)        # lane-dense single output slab

    # Once-per-call prep (amortized over all T grid steps; nothing goes stale
    # because it is recomputed from the raw inputs of every call).
    w_fc = weight.T                    # (C, M+6)  merged fc slab
    b_fc = bias.reshape(1, -1)         # (1, M+6)
    mem_e = memory + 1e-16
    mem_hat_t = (mem_e * lax.rsqrt(jnp.maximum(
        jnp.sum(mem_e * mem_e, axis=1, keepdims=True), 1e-16))).T   # (M, N)

    hid_p = jnp.pad(hid_seq, ((0, 0), (0, Bp - B), (0, 0)))
    # Pad rows carry a uniform (safe) weighting so their softmax/log/exp stay
    # finite; they are sliced off before returning.
    w_init_p = jnp.pad(w_init, ((0, Bp - B), (0, 0)),
                       constant_values=1.0 / float(N))

    def resident(shape):
        return pl.BlockSpec(shape, lambda t, _n=len(shape): (0,) * _n)

    out = pl.pallas_call(
        _ntm_read_seq_kernel,
        out_shape=jax.ShapeDtypeStruct((T, Bp, OUT), f32),
        grid_spec=pltpu.PrefetchScalarGridSpec(
            num_scalar_prefetch=0,
            grid=(T,),
            in_specs=[
                pl.BlockSpec((1, Bp, C), lambda t: (t, 0, 0)),   # hid block t
                resident((Bp, N)),            # w_init (read only at t==0)
                resident(w_fc.shape),         # fc weights, VMEM-resident
                resident(b_fc.shape),         # fc bias, VMEM-resident
                resident(mem_hat_t.shape),    # normalized memory rows^T
                resident(memory.shape),       # raw memory (for the read)
            ],
            out_specs=pl.BlockSpec((1, Bp, OUT), lambda t: (t, 0, 0)),
            scratch_shapes=[pltpu.VMEM((Bp, N), f32)],   # running w state
        ),
        compiler_params=pltpu.CompilerParams(
            dimension_semantics=("arbitrary",)),          # sequential recurrence
    )(hid_p, w_init_p, w_fc, b_fc, mem_hat_t, memory)

    r_seq = out[:, :B, :M]
    w_seq = out[:, :B, M:M + N]
    return r_seq, w_seq


def ntm_read_head(hid, w_pre, weight, bias, memory):
    """Single-step forward with the exact NTMReadHead.forward signature."""
    r_seq, w_seq = ntm_read_head_sequence(hid[None], w_pre, weight, bias, memory)
    return r_seq[0], w_seq[0]


def ntm_read_head_ref_step(hid, w_pre, weight, bias, memory):
    """Pure-JAX single-step reference with identical math (for verification)."""
    N, M = memory.shape
    o = hid @ weight.T + bias
    k, beta, g, s, gamma = (o[:, :M], o[:, M:M + 1], o[:, M + 1:M + 2],
                            o[:, M + 2:M + 5], o[:, M + 5:M + 6])
    beta = jax.nn.softplus(beta)
    g = jax.nn.sigmoid(g)
    s = jax.nn.softmax(s, axis=1)
    gamma = 1.0 + jax.nn.softplus(gamma)
    eps = 1e-16
    k_e, mem_e = k + eps, memory + eps
    k_hat = k_e / jnp.maximum(jnp.linalg.norm(k_e, axis=1, keepdims=True), 1e-8)
    mem_hat = mem_e / jnp.maximum(
        jnp.linalg.norm(mem_e, axis=1, keepdims=True), 1e-8)
    wc = jax.nn.softmax(beta * (k_hat @ mem_hat.T), axis=1)
    wg = g * wc + (1.0 - g) * w_pre
    w_hat = (s[:, 0:1] * jnp.roll(wg, 1, axis=1)
             + s[:, 1:2] * wg
             + s[:, 2:3] * jnp.roll(wg, -1, axis=1))
    w_pow = jnp.power(w_hat, gamma)
    w = w_pow / (jnp.sum(w_pow, axis=1, keepdims=True) + 1e-16)
    r = w @ memory
    return r, w


if __name__ == "__main__":
    B, C, N, M, T = 2, 32, 16, 12, 8       # batch, cdim, mem rows, mem width, steps
    out_dim = M + 1 + 1 + 3 + 1             # sum(read_lens)

    key = jax.random.PRNGKey(0)
    k1, k2, k3, k4 = jax.random.split(key, 4)
    bound = 1.0 / float(jnp.sqrt(C))
    weight = jax.random.uniform(k1, (out_dim, C), jnp.float32, -bound, bound)
    bias = jax.random.uniform(k2, (out_dim,), jnp.float32, -bound, bound)
    memory = jax.random.uniform(k3, (N, M), jnp.float32, -0.1, 0.1)
    hid_seq = jax.random.normal(k4, (T, B, C), jnp.float32)
    w0 = jnp.zeros((B, N), jnp.float32)     # matches create_new_state (zeros)

    # Fused sequence: one pallas_call covering all T recurrent steps.
    r_seq, w_seq = ntm_read_head_sequence(hid_seq, w0, weight, bias, memory)
    jax.block_until_ready((r_seq, w_seq))

    # Step-by-step pure-JAX reference with w fed back.
    w_ref = w0
    rs, ws = [], []
    for t in range(T):
        r_ref, w_ref = ntm_read_head_ref_step(hid_seq[t], w_ref, weight, bias,
                                              memory)
        rs.append(r_ref)
        ws.append(w_ref)
    r_ref_seq = jnp.stack(rs)
    w_ref_seq = jnp.stack(ws)

    assert r_seq.shape == (T, B, M) and w_seq.shape == (T, B, N)
    assert jnp.allclose(r_seq, r_ref_seq, atol=2e-3, rtol=2e-3)
    assert jnp.allclose(w_seq, w_ref_seq, atol=2e-3, rtol=2e-3)

    # Single-step path (exact NTMReadHead.forward semantics) also checks out.
    r1, w1 = ntm_read_head(hid_seq[0], w0, weight, bias, memory)
    jax.block_until_ready((r1, w1))
    assert jnp.allclose(r1, r_ref_seq[0], atol=2e-3, rtol=2e-3)
    assert jnp.allclose(w1, w_ref_seq[0], atol=2e-3, rtol=2e-3)

    print("KERNEL_OK")
</pallas_src>

<mosaic_0001>
module attributes {stable_mosaic.version = 11 : i64} {
  func.func @_ntm_read_seq_kernel(%arg0: i32, %arg1: memref<1x8x32xf32, #tpu.memory_space<vmem>>, %arg2: memref<8x16xf32, #tpu.memory_space<vmem>>, %arg3: memref<32x18xf32, #tpu.memory_space<vmem>>, %arg4: memref<1x18xf32, #tpu.memory_space<vmem>>, %arg5: memref<12x16xf32, #tpu.memory_space<vmem>>, %arg6: memref<16x12xf32, #tpu.memory_space<vmem>>, %arg7: memref<1x8x128xf32, #tpu.memory_space<vmem>>, %arg8: memref<8x16xf32, #tpu.memory_space<vmem>>) attributes {dimension_semantics = [#tpu.dimension_semantics<arbitrary>], iteration_bounds = array<i64: 8>, scalar_prefetch = 0 : i64, scratch_operands = 1 : i64, tpu.core_type = #tpu.core_type<tc>, window_params = [{transform_indices = @transform_0, window_bounds = array<i64: 1, 8, 32>}, {pipeline_mode = #tpu.pipeline_mode<synchronous>, transform_indices = @transform_1, window_bounds = array<i64: 8, 16>}, {pipeline_mode = #tpu.pipeline_mode<synchronous>, transform_indices = @transform_2, window_bounds = array<i64: 32, 18>}, {pipeline_mode = #tpu.pipeline_mode<synchronous>, transform_indices = @transform_3, window_bounds = array<i64: 1, 18>}, {pipeline_mode = #tpu.pipeline_mode<synchronous>, transform_indices = @transform_4, window_bounds = array<i64: 12, 16>}, {pipeline_mode = #tpu.pipeline_mode<synchronous>, transform_indices = @transform_5, window_bounds = array<i64: 16, 12>}, {transform_indices = @transform_6, window_bounds = array<i64: 1, 8, 128>}]} {
    %c0_i32 = arith.constant 0 : i32
    %0 = arith.cmpi eq, %arg0, %c0_i32 : i32
    %1 = arith.extui %0 : i1 to i32
    %c0_i32_0 = arith.constant 0 : i32
    %2 = arith.cmpi ne, %1, %c0_i32_0 : i32
    scf.if %2 {
      %c0_39 = arith.constant 0 : index
      %c0_40 = arith.constant 0 : index
      %130 = vector.load %arg2[%c0_39, %c0_40] : memref<8x16xf32, #tpu.memory_space<vmem>>, vector<8x16xf32>
      %c0_41 = arith.constant 0 : index
      %c0_42 = arith.constant 0 : index
      %131 = vector.load %arg8[%c0_41, %c0_42] : memref<8x16xf32, #tpu.memory_space<vmem>>, vector<8x16xf32>
      tpu.vector_store %arg8[%c0_41, %c0_42], %130 {strides = array<i32>} : memref<8x16xf32, #tpu.memory_space<vmem>>, vector<8x16xf32>,
    } else {
    }
    %c0 = arith.constant 0 : index
    %c0_1 = arith.constant 0 : index
    %c0_2 = arith.constant 0 : index
    %3 = vector.load %arg1[%c0, %c0_1, %c0_2] : memref<1x8x32xf32, #tpu.memory_space<vmem>>, vector<1x8x32xf32>
    %4 = vector.shape_cast %3 : vector<1x8x32xf32> to vector<8x32xf32>
    %c0_3 = arith.constant 0 : index
    %c0_4 = arith.constant 0 : index
    %5 = vector.load %arg8[%c0_3, %c0_4] : memref<8x16xf32, #tpu.memory_space<vmem>>, vector<8x16xf32>
    %c0_5 = arith.constant 0 : index
    %c0_6 = arith.constant 0 : index
    %6 = vector.load %arg3[%c0_5, %c0_6] : memref<32x18xf32, #tpu.memory_space<vmem>>, vector<32x18xf32>
    %cst = arith.constant dense<0.000000e+00> : vector<8x18xf32>
    %7 = tpu.matmul %4, %6, %cst {dimension_numbers = #tpu.dot_dimension_numbers<[1], [0], [0], [1], [0, 0, 1, 1], [], []>} : vector<8x32xf32>, vector<32x18xf32>, vector<8x18xf32> -> vector<8x18xf32>
    %c0_7 = arith.constant 0 : index
    %c0_8 = arith.constant 0 : index
    %8 = vector.load %arg4[%c0_7, %c0_8] : memref<1x18xf32, #tpu.memory_space<vmem>>, vector<1x18xf32>
    %9 = vector.broadcast %8 : vector<1x18xf32> to vector<8x18xf32>
    %10 = arith.addf %7, %9 : vector<8x18xf32>
    %11 = vector.extract_strided_slice %10 {offsets = [0, 0], sizes = [8, 12], strides = [1, 1]} : vector<8x18xf32> to vector<8x12xf32>
    %12 = vector.extract_strided_slice %10 {offsets = [0, 12], sizes = [8, 1], strides = [1, 1]} : vector<8x18xf32> to vector<8x1xf32>
    %cst_9 = arith.constant 0.000000e+00 : f32
    %13 = vector.broadcast %cst_9 : f32 to vector<8x1xf32>
    %14 = arith.maximumf %12, %13 : vector<8x1xf32>
    %15 = vector.broadcast %cst_9 : f32 to vector<8x1xf32>
    %16 = arith.subf %12, %15 : vector<8x1xf32>
    %17 = arith.cmpf one, %16, %16 : vector<8x1xf32>
    %18 = vector.broadcast %cst_9 : f32 to vector<8x1xf32>
    %19 = arith.addf %12, %18 : vector<8x1xf32>
    %20 = math.absf %16 : vector<8x1xf32>
    %cst_10 = arith.constant 0.000000e+00 : f32
    %21 = vector.broadcast %cst_10 : f32 to vector<8x1xf32>
    %22 = arith.subf %21, %20 : vector<8x1xf32>
    %23 = math.exp %22 : vector<8x1xf32>
    %24 = math.log1p %23 : vector<8x1xf32>
    %25 = arith.addf %14, %24 : vector<8x1xf32>
    %26 = arith.select %17, %19, %25 : vector<8x1xi1>, vector<8x1xf32>
    %27 = vector.extract_strided_slice %10 {offsets = [0, 13], sizes = [8, 1], strides = [1, 1]} : vector<8x18xf32> to vector<8x1xf32>
    %28 = arith.negf %27 : vector<8x1xf32>
    %29 = math.exp %28 : vector<8x1xf32>
    %cst_11 = arith.constant 1.000000e+00 : f32
    %30 = vector.broadcast %cst_11 : f32 to vector<8x1xf32>
    %31 = arith.addf %30, %29 : vector<8x1xf32>
    %32 = arith.divf %30, %31 : vector<8x1xf32>
    %33 = vector.extract_strided_slice %10 {offsets = [0, 14], sizes = [8, 3], strides = [1, 1]} : vector<8x18xf32> to vector<8x3xf32>
    %cst_12 = arith.constant dense<0xFF800000> : vector<8xf32>
    %34 = vector.multi_reduction <maximumf>, %33, %cst_12 [1] : vector<8x3xf32> to vector<8xf32>
    %cst_13 = arith.constant 0xFF800000 : f32
    %35 = vector.broadcast %cst_13 : f32 to vector<8xf32>
    %36 = arith.maximumf %35, %34 : vector<8xf32>
    %37 = vector.shape_cast %36 : vector<8xf32> to vector<8x1xf32>
    %38 = vector.broadcast %37 : vector<8x1xf32> to vector<8x3xf32>
    %39 = arith.subf %33, %38 : vector<8x3xf32>
    %40 = math.exp %39 : vector<8x3xf32>
    %cst_14 = arith.constant dense<0.000000e+00> : vector<8xf32>
    %41 = vector.multi_reduction <add>, %40, %cst_14 [1] : vector<8x3xf32> to vector<8xf32>
    %42 = vector.shape_cast %41 : vector<8xf32> to vector<8x1xf32>
    %43 = vector.broadcast %42 : vector<8x1xf32> to vector<8x3xf32>
    %44 = arith.divf %40, %43 : vector<8x3xf32>
    %45 = vector.extract_strided_slice %10 {offsets = [0, 17], sizes = [8, 1], strides = [1, 1]} : vector<8x18xf32> to vector<8x1xf32>
    %cst_15 = arith.constant 0.000000e+00 : f32
    %46 = vector.broadcast %cst_15 : f32 to vector<8x1xf32>
    %47 = arith.maximumf %45, %46 : vector<8x1xf32>
    %48 = vector.broadcast %cst_15 : f32 to vector<8x1xf32>
    %49 = arith.subf %45, %48 : vector<8x1xf32>
    %50 = arith.cmpf one, %49, %49 : vector<8x1xf32>
    %51 = vector.broadcast %cst_15 : f32 to vector<8x1xf32>
    %52 = arith.addf %45, %51 : vector<8x1xf32>
    %53 = math.absf %49 : vector<8x1xf32>
    %cst_16 = arith.constant 0.000000e+00 : f32
    %54 = vector.broadcast %cst_16 : f32 to vector<8x1xf32>
    %55 = arith.subf %54, %53 : vector<8x1xf32>
    %56 = math.exp %55 : vector<8x1xf32>
    %57 = math.log1p %56 : vector<8x1xf32>
    %58 = arith.addf %47, %57 : vector<8x1xf32>
    %59 = arith.select %50, %52, %58 : vector<8x1xi1>, vector<8x1xf32>
    %cst_17 = arith.constant 1.000000e+00 : f32
    %60 = vector.broadcast %cst_17 : f32 to vector<8x1xf32>
    %61 = arith.addf %60, %59 : vector<8x1xf32>
    %cst_18 = arith.constant 1.000000e-16 : f32
    %62 = vector.broadcast %cst_18 : f32 to vector<8x12xf32>
    %63 = arith.addf %11, %62 : vector<8x12xf32>
    %64 = arith.mulf %63, %63 : vector<8x12xf32>
    %cst_19 = arith.constant dense<0.000000e+00> : vector<8xf32>
    %65 = vector.multi_reduction <add>, %64, %cst_19 [1] : vector<8x12xf32> to vector<8xf32>
    %66 = vector.shape_cast %65 : vector<8xf32> to vector<8x1xf32>
    %cst_20 = arith.constant 1.000000e-16 : f32
    %67 = vector.broadcast %cst_20 : f32 to vector<8x1xf32>
    %68 = arith.maximumf %66, %67 : vector<8x1xf32>
    %69 = math.rsqrt %68 : vector<8x1xf32>
    %70 = vector.broadcast %69 : vector<8x1xf32> to vector<8x12xf32>
    %71 = arith.mulf %63, %70 : vector<8x12xf32>
    %c0_21 = arith.constant 0 : index
    %c0_22 = arith.constant 0 : index
    %72 = vector.load %arg5[%c0_21, %c0_22] : memref<12x16xf32, #tpu.memory_space<vmem>>, vector<12x16xf32>
    %cst_23 = arith.constant dense<0.000000e+00> : vector<8x16xf32>
    %73 = tpu.matmul %71, %72, %cst_23 {dimension_numbers = #tpu.dot_dimension_numbers<[1], [0], [0], [1], [0, 0, 1, 1], [], []>} : vector<8x12xf32>, vector<12x16xf32>, vector<8x16xf32> -> vector<8x16xf32>
    %74 = vector.broadcast %26 : vector<8x1xf32> to vector<8x16xf32>
    %75 = arith.mulf %74, %73 : vector<8x16xf32>
    %cst_24 = arith.constant dense<0xFF800000> : vector<8xf32>
    %76 = vector.multi_reduction <maximumf>, %75, %cst_24 [1] : vector<8x16xf32> to vector<8xf32>
    %77 = vector.shape_cast %76 : vector<8xf32> to vector<8x1xf32>
    %78 = vector.broadcast %77 : vector<8x1xf32> to vector<8x16xf32>
    %79 = arith.subf %75, %78 : vector<8x16xf32>
    %80 = math.exp %79 : vector<8x16xf32>
    %cst_25 = arith.constant dense<0.000000e+00> : vector<8xf32>
    %81 = vector.multi_reduction <add>, %80, %cst_25 [1] : vector<8x16xf32> to vector<8xf32>
    %82 = vector.shape_cast %81 : vector<8xf32> to vector<8x1xf32>
    %83 = tpu.reciprocal %82 {approx = true} : vector<8x1xf32> -> vector<8x1xf32>
    %84 = vector.broadcast %83 : vector<8x1xf32> to vector<8x16xf32>
    %85 = arith.mulf %80, %84 : vector<8x16xf32>
    %86 = vector.broadcast %32 : vector<8x1xf32> to vector<8x16xf32>
    %87 = arith.mulf %86, %85 : vector<8x16xf32>
    %cst_26 = arith.constant 1.000000e+00 : f32
    %88 = vector.broadcast %cst_26 : f32 to vector<8x1xf32>
    %89 = arith.subf %88, %32 : vector<8x1xf32>
    %90 = vector.broadcast %89 : vector<8x1xf32> to vector<8x16xf32>
    %91 = arith.mulf %90, %5 : vector<8x16xf32>
    %92 = arith.addf %87, %91 : vector<8x16xf32>
    %93 = vector.extract_strided_slice %92 {offsets = [0, 15], sizes = [8, 1], strides = [1, 1]} : vector<8x16xf32> to vector<8x1xf32>
    %94 = vector.extract_strided_slice %92 {offsets = [0, 0], sizes = [8, 1], strides = [1, 1]} : vector<8x16xf32> to vector<8x1xf32>
    %95 = tpu.concatenate %93, %92, %94 in 1 : vector<8x1xf32>, vector<8x16xf32>, vector<8x1xf32> -> vector<8x18xf32>
    %96 = vector.extract_strided_slice %44 {offsets = [0, 0], sizes = [8, 1], strides = [1, 1]} : vector<8x3xf32> to vector<8x1xf32>
    %97 = vector.extract_strided_slice %95 {offsets = [0, 0], sizes = [8, 16], strides = [1, 1]} : vector<8x18xf32> to vector<8x16xf32>
    %98 = vector.broadcast %96 : vector<8x1xf32> to vector<8x16xf32>
    %99 = arith.mulf %98, %97 : vector<8x16xf32>
    %100 = vector.extract_strided_slice %44 {offsets = [0, 1], sizes = [8, 1], strides = [1, 1]} : vector<8x3xf32> to vector<8x1xf32>
    %101 = vector.extract_strided_slice %95 {offsets = [0, 1], sizes = [8, 16], strides = [1, 1]} : vector<8x18xf32> to vector<8x16xf32>
    %102 = vector.broadcast %100 : vector<8x1xf32> to vector<8x16xf32>
    %103 = arith.mulf %102, %101 : vector<8x16xf32>
    %104 = arith.addf %99, %103 : vector<8x16xf32>
    %105 = vector.extract_strided_slice %44 {offsets = [0, 2], sizes = [8, 1], strides = [1, 1]} : vector<8x3xf32> to vector<8x1xf32>
    %106 = vector.extract_strided_slice %95 {offsets = [0, 2], sizes = [8, 16], strides = [1, 1]} : vector<8x18xf32> to vector<8x16xf32>
    %107 = vector.broadcast %105 : vector<8x1xf32> to vector<8x16xf32>
    %108 = arith.mulf %107, %106 : vector<8x16xf32>
    %109 = arith.addf %104, %108 : vector<8x16xf32>
    %cst_27 = arith.constant 1.000000e-30 : f32
    %110 = vector.broadcast %cst_27 : f32 to vector<8x16xf32>
    %111 = arith.addf %109, %110 : vector<8x16xf32>
    %112 = math.log %111 : vector<8x16xf32>
    %113 = vector.broadcast %61 : vector<8x1xf32> to vector<8x16xf32>
    %114 = arith.mulf %113, %112 : vector<8x16xf32>
    %115 = math.exp %114 : vector<8x16xf32>
    %cst_28 = arith.constant dense<0.000000e+00> : vector<8xf32>
    %116 = vector.multi_reduction <add>, %115, %cst_28 [1] : vector<8x16xf32> to vector<8xf32>
    %117 = vector.shape_cast %116 : vector<8xf32> to vector<8x1xf32>
    %cst_29 = arith.constant 1.000000e-16 : f32
    %118 = vector.broadcast %cst_29 : f32 to vector<8x1xf32>
    %119 = arith.addf %117, %118 : vector<8x1xf32>
    %120 = vector.broadcast %119 : vector<8x1xf32> to vector<8x16xf32>
    %121 = arith.divf %115, %120 : vector<8x16xf32>
    %c0_30 = arith.constant 0 : index
    %c0_31 = arith.constant 0 : index
    %122 = vector.load %arg8[%c0_30, %c0_31] : memref<8x16xf32, #tpu.memory_space<vmem>>, vector<8x16xf32>
    tpu.vector_store %arg8[%c0_30, %c0_31], %121 {strides = array<i32>} : memref<8x16xf32, #tpu.memory_space<vmem>>, vector<8x16xf32>,
    %c0_32 = arith.constant 0 : index
    %c0_33 = arith.constant 0 : index
    %123 = vector.load %arg6[%c0_32, %c0_33] : memref<16x12xf32, #tpu.memory_space<vmem>>, vector<16x12xf32>
    %cst_34 = arith.constant dense<0.000000e+00> : vector<8x12xf32>
    %124 = tpu.matmul %121, %123, %cst_34 {dimension_numbers = #tpu.dot_dimension_numbers<[1], [0], [0], [1], [0, 0, 1, 1], [], []>} : vector<8x16xf32>, vector<16x12xf32>, vector<8x12xf32> -> vector<8x12xf32>
    %cst_35 = arith.constant 0.000000e+00 : f32
    %125 = vector.broadcast %cst_35 : f32 to vector<8x100xf32>
    %126 = tpu.concatenate %124, %121, %125 in 1 : vector<8x12xf32>, vector<8x16xf32>, vector<8x100xf32> -> vector<8x128xf32>
    %c0_36 = arith.constant 0 : index
    %c0_37 = arith.constant 0 : index
    %c0_38 = arith.constant 0 : index
    %127 = vector.load %arg7[%c0_36, %c0_37, %c0_38] : memref<1x8x128xf32, #tpu.memory_space<vmem>>, vector<1x8x128xf32>
    %128 = vector.shape_cast %127 : vector<1x8x128xf32> to vector<8x128xf32>
    %129 = vector.shape_cast %126 : vector<8x128xf32> to vector<1x8x128xf32>
    tpu.vector_store %arg7[%c0_36, %c0_37, %c0_38], %129 {strides = array<i32>} : memref<1x8x128xf32, #tpu.memory_space<vmem>>, vector<1x8x128xf32>,
    return
  }
  func.func @transform_0(%arg0: i32) -> (i32, i32, i32) {
    %c0_i32 = arith.constant 0 : i32
    %c0_i32_0 = arith.constant 0 : i32
    %c0_i32_1 = arith.constant 0 : i32
    return %arg0, %c0_i32, %c0_i32_0 : i32, i32, i32
  }
  func.func @transform_1(%arg0: i32) -> (i32, i32) {
    %c0_i32 = arith.constant 0 : i32
    %c0_i32_0 = arith.constant 0 : i32
    %c0_i32_1 = arith.constant 0 : i32
    return %c0_i32, %c0_i32_0 : i32, i32
  }
  func.func @transform_2(%arg0: i32) -> (i32, i32) {
    %c0_i32 = arith.constant 0 : i32
    %c0_i32_0 = arith.constant 0 : i32
    %c0_i32_1 = arith.constant 0 : i32
    return %c0_i32, %c0_i32_0 : i32, i32
  }
  func.func @transform_3(%arg0: i32) -> (i32, i32) {
    %c0_i32 = arith.constant 0 : i32
    %c0_i32_0 = arith.constant 0 : i32
    %c0_i32_1 = arith.constant 0 : i32
    return %c0_i32, %c0_i32_0 : i32, i32
  }
  func.func @transform_4(%arg0: i32) -> (i32, i32) {
    %c0_i32 = arith.constant 0 : i32
    %c0_i32_0 = arith.constant 0 : i32
    %c0_i32_1 = arith.constant 0 : i32
    return %c0_i32, %c0_i32_0 : i32, i32
  }
  func.func @transform_5(%arg0: i32) -> (i32, i32) {
    %c0_i32 = arith.constant 0 : i32
    %c0_i32_0 = arith.constant 0 : i32
    %c0_i32_1 = arith.constant 0 : i32
    return %c0_i32, %c0_i32_0 : i32, i32
  }
  func.func @transform_6(%arg0: i32) -> (i32, i32, i32) {
    %c0_i32 = arith.constant 0 : i32
    %c0_i32_0 = arith.constant 0 : i32
    %c0_i32_1 = arith.constant 0 : i32
    return %arg0, %c0_i32, %c0_i32_0 : i32, i32, i32
  }
}

</mosaic_0001>

<bundles_post_ra>
// kernel: ntm_read_head_sequence.1
= control target key start
LH: loop header
LB: loop body
LE: loop exit
PB: predicated region body
PF: predicated region fallthrough
CT: control target
= control target key end

     0   :  { %s877_s21 = smov 0   ;;  %s942_s0 = inlined_call_operand.vmem [shape: f32[8,8,32], index: 0, kind: input, shape index: {}]   ;;  %s943_s1 = inlined_call_operand.vmem [shape: f32[8,16], index: 1, kind: input, shape index: {}]   ;;  %s944_s2 = inlined_call_operand.vmem [shape: f32[32,18], index: 2, kind: input, shape index: {}]   ;;  %s945_s3 = inlined_call_operand.vmem [shape: f32[1,18], index: 3, kind: input, shape index: {}]   ;;  %s946_s4 = inlined_call_operand.vmem [shape: f32[12,16], index: 4, kind: input, shape index: {}]   ;;  %s947_s5 = inlined_call_operand.vmem [shape: f32[16,12], index: 5, kind: input, shape index: {}]   ;;  %s948_s6 = inlined_call_operand.vmem [shape: f32[8,8,128], index: 6, kind: output, shape index: {}]  }
   0x1 LB: > { %s696_s22 = sadd.s32 4294967295, %s823_s21   ;;  %p700_p0 = scmp.ge.s32.totalorder %s823_s21, 1  ;;  %s823_s21 = sphi %s877_s21, %s16_s21  }
   0x2   : > { %p211_p1 = scmp.lt.s32.totalorder %s823_s21, 9 }
   0x4   : > { %p212_p2 = pnand %p700_p0, %p211_p1 }
   0x5   : > { %p239_p3 = scmp.lt.s32.totalorder (!%p212_p2), %s696_s22, 7  ;;  %p703_p4 = scmp.ne.s32.totalorder (!%p212_p2), %s696_s22, 0 }
   0x6   : > { %215 = sbr.rel (%p212_p2) target bundleno = 1591 (0x637), region = 44 }
   0xd   : > { %s240_s23 = scalar_select %p239_p3, %s696_s22, 7 }
   0xe   : > { %250 = sbr.rel (%p703_p4) target bundleno = 21 (0x15), region = 48  ;;  %v251_v0 = vld [vmem:[%s943_s1] sm:$0xff] (!%p703_p4)  ;;  %vm252_vm0 = vcmask (!%p703_p4), 130048  }
   0xf   : > { %s701_s24 = sshll.u32 %s240_s23, 3  ;;  %253 = vst.msk [vmem:[#allocation2] sm:$0xff] (!%p703_p4), %vm252_vm0, %v251_v0 }
  0x10   : > { %s242_s27 = scalar_lea.vmem %s942_s0, %s701_s24  ;;  %s891_s30 = scalar_lea.vmem %s948_s6, %s701_s24 }
  0x15 PF: > { %v256_v1 = vld [vmem:[%s944_s2] sm:$0xff]  ;;  %v257_v2 = vld [vmem:[%s944_s2 + $0x8] sm:$0xff]  ;;  %v258_v3 = vld [vmem:[%s944_s2 + $0x10] sm:$0xff]  ;;  %v825_v4 = vmov 0.0|0.0   ;;  %vm826_vm1 = vmmov 0   ;;  %v827_v7 = vmov 0.0  }
  0x16   : > { %748 = vmatprep.subr.bf16.mxu0 %v825_v4  ;;  %v749_v5 = vpack.c.bf16 %v257_v2, %v256_v1  ;;  %v259_v6 = vld [vmem:[%s944_s2 + $0x18] sm:$0xff]  ;;  %731 = vmatprep.mubr.msk.f32.mxu0 %vm826_vm1, %v827_v7  ;;  %v254_v9 = vld [vmem:[%s242_s27] sm:$0xff]  ;;  %vm267_vm2 = vcmask 261120   ;;  %v828_v10 = vmov 12   ;;  %vm365_vm3 = vcmask 138352   ;;  %s830_s24 = smov 114  }
  0x17   : > { %754 = vmatprep.subr.bf16.mxu1 %v825_v4  ;;  %738 = vmatprep.mubr.msk.f32.mxu1 %vm826_vm1, %v827_v7  ;;  %v752_v8 = vpack.c.bf16 %v259_v6, %v258_v3  ;;  %v704_v11 = vld [vmem:[%s945_s3] ss:$0 sm:$0xff]  ;;  %vm385_vm4 = vcmask 97280   ;;  %v393_v25 = vld [vmem:[%s946_s4 + $0x8] sm:$0xf]  ;;  %vm397_vm5 = vcmask 1043456  }
  0x18   : > { %750 = vmatpush3.bf16.msra.mxu0 %v749_v5  ;;  %786 = vset.pattern.permute.xlu0 %v828_v10  ;;  %v392_v24 = vld [vmem:[%s946_s4] sm:$0xff]  ;;  %vm829_vm6 = vmmov 1   ;;  %vm477_vm10 = vcmask 130048   ;;  %v831_v50 = vmov 13   ;;  %vm376_vm11 = vcmask 23552   ;;  %s835_s25 = smov 113  }
  0x19   : > { %751 = vmatprep.subr.bf16.mxu0 %v825_v4  ;;  %v755_v27 = vpack.c.bf16 %v393_v25, %v392_v24  ;;  %vm756_vm7 = vmpackc.low %vm397_vm5, %vm829_vm6  ;;  %787 = vset.pattern.permute.xlu1 %v831_v50  ;;  %v832_v63 = vmov 15   ;;  %v833_v0 = vmov 16   ;;  %v834_v6 = vmov 14   ;;  %s836_s26 = smov 1   ;;  %s838_s27 = smov 17  }
  0x1a   : > { %vm513_vm12 = vcmask 7168   ;;  %vm515_vm13 = vcmask 138240   ;;  %s839_s28 = smov 127   ;;  %s840_s29 = smov 126   ;;  %vm640_vm14 = vcmask 228352  }
  0x1b   : > { %757 = vmatpush3.bf16.msk.msra.mxu1 %vm756_vm7, %v755_v27  ;;  %s841_s11 = smov 12  }
  0x1c   : > { %753 = vmatpush3.bf16.msra.mxu0 %v752_v8  ;;  %758 = vmatprep.subr.bf16.mxu1 %v825_v4  ;;  %v255_v8 = vld [vmem:[#allocation2] sm:$0xff] }
  0x1f   : > { %732 = vmatmul.mubr.msk.f32.vlgmr.msra.gmra.mrb[0].mxu0 %vm267_vm2, %v254_v9 }
  0xf2   : > { %v337_v12 = vpop.f32.mrb[0].mxu0 }
  0xf3   : > { %v338_v13 = vadd.f32 %v704_v11, %v337_v12  ;;  %v733_v14 = vpop.f32.mrb[1].mxu0 }
  0xf4   : > { %v837_v14 = vmov 17  }
  0xf5   : > { %v344_v15 = vand.u32 2147483647, %v338_v13  ;;  %v366_v16 = vsel %vm365_vm3, %v338_v13, -inf  ;;  %v383_v17 = vadd.f32 1e-16, %v338_v13  ;;  %v341_v33 = vmax.f32 %v338_v13, 0.0 }
  0xf6   : > { %367 = vmax.xlane.f32.xlu1 %v366_v16  ;;  %vm342_vm9 = vcmp.ne.f32.partialorder %v338_v13, %v338_v13  ;;  %v706_v51 = vmul.f32 -1.442695, %v338_v13 }
  0xf7   : > { %v345_v18 = vsub.f32 0.0, %v344_v15  ;;  %v384_v19 = vmul.f32 %v383_v17, %v383_v17 }
  0xf9   : > { %v346_v20 = vmul.f32 1.442695, %v345_v18  ;;  %v386_v21 = vsel %vm385_vm4, %v384_v19, 0.0 }
  0xfa   : > { %387 = vadd.xlane.f32.xlu0 %v386_v21 }
  0xfb   : > { %793 = vpow2.f32 %v346_v20 }
 0x105   : > { %v794_v22 = vpop.eup %793 }
 0x106   : > { %v348_v23 = vadd.f32 1.0, %v794_v22  ;;  %v351_v26 = vmul.f32 -0.5, %v794_v22  ;;  %v354_v29 = vand.u32 2147483647, %v794_v22 }
 0x108   : > { %795 = vlog2.f32 %v348_v23  ;;  %v352_v28 = vadd.f32 1.0, %v351_v26  ;;  %vm355_vm8 = vcmp.lt.f32.partialorder %v354_v29, 0.0004427343 }
 0x10a   : > { %v353_v32 = vmul.f32 %v794_v22, %v352_v28 }
 0x112   : > { %v796_v30 = vpop.eup %795 }
 0x113   : > { %v350_v31 = vmul.f32 0.6931472, %v796_v30 }
 0x115   : > { %v356_v34 = vsel %vm355_vm8, %v353_v32, %v350_v31 }
 0x116   : > { %v357_v35 = vadd.f32 %v356_v34, %v341_v33 }
 0x118   : > { %v920_v36 = vsel %vm342_vm9, %v338_v13, %v357_v35 }
 0x119   : > { %473 = vperm.xlu0 %786, %v920_v36   ;;  %v382_v24 = vadd.f32 1.0, %v920_v36  ;;  %v561_v36 = vld [vmem:[%s947_s5] sm:$0xff] }
 0x11d   : > { %788 = vset.pattern.permute.xlu0 %v832_v63 }
 0x183   : > { %v368_v41 = vpop.xlane.xlu1 %367 }
 0x184   : > { %v369_v46 = vsub.f32 %v338_v13, %v368_v41 }
 0x186   : > { %v370_v48 = vmul.f32 1.442695, %v369_v46 }
 0x187   : > { %v388_v37 = vpop.xlane.xlu0 %387 }
 0x188   : > { %v389_v38 = vmax.f32 %v388_v37, 1e-16 }
 0x18a   : > { %797 = vrsqrt.f32 %v389_v38 }
 0x18b   : > { %799 = vpow2.f32 %v370_v48 }
 0x18c   : > { %801 = vpow2.f32 %v706_v51 }
 0x194   : > { %v798_v39 = vpop.eup %797 }
 0x195   : > { %v391_v40 = vmul.f32 %v798_v39, %v383_v17  ;;  %v800_v49 = vpop.eup %799 }
 0x196   : > { %v802_v56 = vpop.eup %801 }
 0x197   : > { %739 = vmatmul.mubr.msk.f32.vlgmr.msra.gmra.mrb[0].mxu1 %vm385_vm4, %v391_v40  ;;  %v362_v58 = vadd.f32 1.0, %v802_v56  ;;  %v562_v40 = vld [vmem:[%s947_s5 + $0x8] sm:$0xff] }
 0x198   : > { %745 = vmatprep.mubr.msk.f32.mxu1 %vm826_vm1, %v827_v7  ;;  %v474_v42 = vpop.permute.xlu0 %473  ;;  %v759_v41 = vpack.c.bf16 %v562_v40, %v561_v36 }
 0x19a   : > { %760 = vmatpush3.bf16.msra.mxu1 %v759_v41 }
 0x26a   : > { %v467_v43 = vpop.f32.mrb[0].mxu1 }
 0x26b   : > { %v476_v44 = vmul.f32 %v474_v42, %v467_v43  ;;  %v740_v45 = vpop.f32.mrb[1].mxu1 }
 0x26d   : > { %v478_v47 = vsel %vm477_vm10, %v476_v44, -inf }
 0x26e   : > { %479 = vmax.xlane.f32.xlu1 %v478_v47 }
 0x27f   : > { %373 = vrot.lane.b32.xlu1 %v800_v49, %s830_s24 }
 0x2fb   : > { %v480_v52 = vpop.xlane.xlu1 %479 }
 0x2fc   : > { %v481_v53 = vsub.f32 %v476_v44, %v480_v52 }
 0x2fe   : > { %v482_v54 = vmul.f32 1.442695, %v481_v53 }
 0x2ff   : > { %v374_v55 = vpop.permute.xlu1 %373 }
 0x300   : > { %803 = vpow2.f32 %v482_v54  ;;  %v377_v57 = vsel %vm376_vm11, %v374_v55, 0.0 }
 0x301   : > { %378 = vadd.xlane.f32.xlu1 %v377_v57  ;;  %805 = vrcp.f32 %v362_v58 }
 0x30a   : > { %v804_v59 = vpop.eup %803 }
 0x30b   : > { %v484_v60 = vsel %vm477_vm10, %v804_v59, 0.0  ;;  %v806_v61 = vpop.eup %805 }
 0x30c   : > { %485 = vadd.xlane.f32.xlu0 %v484_v60  ;;  %v495_v62 = vsub.f32 1.0, %v806_v61 }
 0x312   : > { %491 = vperm.xlu1 %787, %v806_v61  }
 0x316   : > { %498 = vperm.xlu1 %787, %v495_v62  }
 0x31a   : > { %789 = vset.pattern.permute.xlu1 %v833_v0 }
 0x38e   : > { %v379_v1 = vpop.xlane.xlu1 %378 }
 0x38f   : > { %807 = vrcp.f32 %v379_v1 }
 0x392   : > { %v492_v5 = vpop.permute.xlu1 %491 }
 0x396   : > { %v499_v9 = vpop.permute.xlu1 %498 }
 0x397   : > { %v501_v11 = vmul.f32 %v499_v9, %v255_v8 }
 0x399   : > { %v808_v2 = vpop.eup %807  ;;  %v486_v3 = vpop.xlane.xlu0 %485 }
 0x39a   : > { %809 = vrcp.f32 %v486_v3  ;;  %v381_v4 = vmul.f32 %v808_v2, %v800_v49 }
 0x39c   : > { %534 = vperm.xlu1 %789, %v381_v4   ;;  %524 = vperm.xlu0 %788, %v381_v4  }
 0x3a0   : > { %790 = vset.pattern.permute.xlu1 %v834_v6  ;;  %792 = vset.pattern.permute.xlu0 %v837_v14 }
 0x3a4   : > { %v810_v7 = vpop.eup %809 }
 0x3a5   : > { %v488_v10 = vmul.f32 %v810_v7, %v804_v59 }
 0x3a7   : > { %v494_v12 = vmul.f32 %v492_v5, %v488_v10 }
 0x3a9   : > { %v502_v13 = vadd.f32 %v501_v11, %v494_v12 }
 0x3ab   : > { %504 = vrot.lane.b32.xlu1 %v502_v13, %s835_s25 }
 0x3af   : > { %507 = vrot.lane.b32.xlu1 %v502_v13, %s836_s26 }
 0x3b3   : > { %510 = vrot.lane.b32.xlu1 %v502_v13, %s838_s27 }
 0x3b7   : > { %519 = vperm.xlu1 %790, %v381_v4  }
 0x3bb   : > { %791 = vset.pattern.permute.xlu1 %v837_v14 }
 0x41b   : > { %v535_v15 = vpop.permute.xlu1 %534  ;;  %v525_v20 = vpop.permute.xlu0 %524 }
 0x41f   : > { %v505_v16 = vpop.permute.xlu1 %504 }
 0x423   : > { %v508_v17 = vpop.permute.xlu1 %507 }
 0x424   : > { %v514_v18 = vsel %vm513_vm12, %v505_v16, %v508_v17 }
 0x427   : > { %v511_v19 = vpop.permute.xlu1 %510 }
 0x428   : > { %v516_v21 = vsel %vm515_vm13, %v514_v18, %v511_v19 }
 0x429   : > { %v527_v22 = vmul.f32 %v525_v20, %v516_v21  ;;  %v537_v23 = vmul.f32 %v535_v15, %v516_v21 }
 0x42b   : > { %529 = vrot.lane.b32.xlu1 %v527_v22, %s839_s28 }
 0x42f   : > { %539 = vrot.lane.b32.xlu1 %v537_v23, %s840_s29 }
 0x433   : > { %548 = vperm.xlu1 %791, %v382_v24  }
 0x436   : > { %v520_v25 = vpop.permute.xlu1 %519 }
 0x437   : > { %v522_v27 = vmul.f32 %v520_v25, %v516_v21 }
 0x49d   : > { %v530_v26 = vpop.permute.xlu1 %529 }
 0x49e   : > { %v532_v28 = vadd.f32 %v530_v26, %v522_v27 }
 0x4a1   : > { %v540_v29 = vpop.permute.xlu1 %539 }
 0x4a2   : > { %v542_v30 = vadd.f32 %v540_v29, %v532_v28 }
 0x4a4   : > { %v543_v31 = vadd.f32 1e-30, %v542_v30 }
 0x4a6   : > { %811 = vlog2.f32 %v543_v31 }
 0x4b0   : > { %v812_v32 = vpop.eup %811 }
 0x4b1   : > { %v545_v33 = vmul.f32 0.6931472, %v812_v32 }
 0x4b2   : > { %v549_v34 = vpop.permute.xlu1 %548 }
 0x4b3   : > { %v551_v35 = vmul.f32 %v549_v34, %v545_v33 }
 0x4b5   : > { %v552_v37 = vmul.f32 1.442695, %v551_v35 }
 0x4b7   : > { %813 = vpow2.f32 %v552_v37 }
 0x4c1   : > { %v814_v38 = vpop.eup %813 }
 0x4c2   : > { %v554_v39 = vsel %vm477_vm10, %v814_v38, 0.0 }
 0x4c3   : > { %555 = vadd.xlane.f32.xlu1 %v554_v39 }
 0x550   : > { %v556_v42 = vpop.xlane.xlu1 %555 }
 0x551   : > { %v557_v43 = vadd.f32 1e-16, %v556_v42 }
 0x553   : > { %815 = vrcp.f32 %v557_v43 }
 0x55d   : > { %v816_v44 = vpop.eup %815 }
 0x55e   : > { %v559_v45 = vmul.f32 %v816_v44, %v814_v38 }
 0x560   : > { %636 = vrot.lane.b32.xlu0 %v559_v45, %s841_s11  ;;  %560 = vst.msk [vmem:[#allocation2] sm:$0xff] %vm477_vm10, %v559_v45  ;;  %746 = vmatmul.mubr.msk.f32.vlgmr.msra.gmra.mrb[2].mxu1 %vm477_vm10, %v559_v45 }
 0x5d2   : > { %v637_v46 = vpop.permute.xlu0 %636 }
 0x633   : > { %v632_v47 = vpop.f32.mrb[2].mxu1 }
 0x634   : > { %v639_v48 = vsel %vm385_vm4, %v632_v47, %v637_v46  ;;  %v747_v49 = vpop.f32.mrb[3].mxu1 }
 0x635   : > { %v641_v50 = vsel %vm640_vm14, %v639_v48, 0.0 }
 0x636   : > { %642 = vst [vmem:[%s891_s30] sm:$0xff] %v641_v50 }
 0x637 PF: > { %s16_s21 = sadd.s32 1, %s823_s21  }
 0x638   : > { %p13_p5 = scmp.ge.s32.totalorder %s16_s21, 10  }
 0x63a   :  { %15 = sbr.rel (!%p13_p5) target bundleno = 1 (0x1), region = 78 }

</bundles_post_ra>
